<compile_context>
chip_gen: v6e
topology: v6e:2x2x1
jax: 0.10.0
libtpu: 0.0.40
codegen_flags: <defaults>
</compile_context>

<pallas_src>
import functools

import jax
import jax.numpy as jnp
from jax.experimental import pallas as pl
from jax.experimental.pallas import tpu as pltpu

_LANES = 128
_SUBLANES = 8
_DEFAULT_TILE_B = 256  # ~85% of HBM roofline territory; sweep 256/512 per-chip.


def _round_up(n, m):
    return ((n + m - 1) // m) * m


def _mlp_fused_kernel(*refs, n_layers):
    """Fully fused MLP for one batch tile.

    Ref layout: (x_ref, w0..w{L-1}, b0..b{L-1}, o_ref)
      x_ref : (TILE_B, In0)        activations (f32)
      w_i   : (In_i, Out_i_pad)    pre-transposed, lane-padded weights
                                   (f32 or bf16; stay VMEM-resident across grid)
      b_i   : (1, Out_i_pad)       biases (f32, lane-padded)
      o_ref : (TILE_B, Out_pad)    lane-dense output tile
    Intermediate activations never leave vregs/VMEM. Matmul inputs are cast to
    the weight dtype (bf16 path uses the MXU natively); accumulation, bias add
    and tanh stay f32 (v5e VPU/EUP have no bf16).
    """
    x_ref = refs[0]
    w_refs = refs[1:1 + n_layers]
    b_refs = refs[1 + n_layers:1 + 2 * n_layers]
    o_ref = refs[-1]

    h = x_ref[...].astype(jnp.float32)
    for i in range(n_layers):  # static unroll (n_layers known at trace time)
        w = w_refs[i][...]
        h = jnp.dot(h.astype(w.dtype), w, preferred_element_type=jnp.float32)
        h = h + b_refs[i][...].astype(jnp.float32)
        if i < n_layers - 1:  # Tanh after every layer except the last
            h = jnp.tanh(h)
    o_ref[...] = h.astype(o_ref.dtype)


def init_mlp_params(key, sizes, dtype=jnp.float32):
    """nn.Linear-style init (U[-1/sqrt(fan_in), 1/sqrt(fan_in)]).

    Weights are stored directly as (In, Out) so the hot path never transposes.
    """
    params = []
    for i in range(len(sizes) - 1):
        fan_in, fan_out = sizes[i], sizes[i + 1]
        key, kw, kb = jax.random.split(key, 3)
        bound = 1.0 / float(fan_in) ** 0.5
        w_t = jax.random.uniform(kw, (fan_in, fan_out), dtype, -bound, bound)
        b = jax.random.uniform(kb, (fan_out,), dtype, -bound, bound)
        params.append((w_t, b))
    return params


def prepare_params(params, compute_dtype=jnp.float32):
    """One-time prep (outside the hot path):
      * every layer's output dim (and the next layer's input dim) zero-padded
        to a multiple of 128 lanes -> lane-dense intermediates & output store,
      * weights cast to `compute_dtype` (bf16 recommended for MXU throughput),
      * bias -> (1, Out_pad) f32 row.
    Zero-padding is exact: padded columns are x@0 + 0, tanh(0)=0, and padded
    rows of the next layer multiply those zeros.
    """
    prepped = []
    prev_out_pad = None
    for i, (w_t, b) in enumerate(params):
        fan_in, fan_out = w_t.shape
        in_pad = fan_in if i == 0 else prev_out_pad
        out_pad = _round_up(fan_out, _LANES)
        w_p = jnp.zeros((in_pad, out_pad), compute_dtype)
        w_p = w_p.at[:fan_in, :fan_out].set(w_t.astype(compute_dtype))
        b_p = jnp.zeros((1, out_pad), jnp.float32)
        b_p = b_p.at[0, :fan_out].set(b.astype(jnp.float32))
        prepped.append((w_p, b_p))
        prev_out_pad = out_pad
    return prepped


@functools.partial(jax.jit, static_argnames=("out_dim", "tile_b", "trim_output"))
def mlp_forward(prepped_params, x, *, out_dim, tile_b=_DEFAULT_TILE_B,
                trim_output=True):
    """Equivalent of MLP.forward: one fused, batch-tiled pallas_call."""
    n_layers = len(prepped_params)
    B, in0 = x.shape
    out_pad = prepped_params[-1][0].shape[1]
    w_list = [w for (w, _) in prepped_params]
    b_list = [b for (_, b) in prepped_params]

    # ---- pick the batch tile; pad batch (zeros) so the grid divides evenly ----
    if B <= tile_b:
        tb = B                                   # single block == full dim (legal)
    else:
        tb = max((tile_b // _SUBLANES) * _SUBLANES, _SUBLANES)
    b_pad = _round_up(B, tb)
    x_in = x if b_pad == B else jnp.pad(x, ((0, b_pad - B), (0, 0)))
    grid = (b_pad // tb,)

    # x / out are tiled over batch; weights & biases are constant-index -> resident.
    in_specs = [pl.BlockSpec((tb, in0), lambda i: (i, 0))]
    for w in w_list:
        in_specs.append(pl.BlockSpec(w.shape, lambda i: (0, 0)))
    for b in b_list:
        in_specs.append(pl.BlockSpec(b.shape, lambda i: (0, 0)))
    out_specs = pl.BlockSpec((tb, out_pad), lambda i: (i, 0))

    # ---- advisory cost estimate for XLA scheduling ----
    itemsize = x.dtype.itemsize
    flops = 2 * b_pad * sum(w.shape[0] * w.shape[1] for w in w_list)
    transcendentals = b_pad * sum(w.shape[1] for w in w_list[:-1])
    bytes_accessed = (b_pad * in0 * itemsize
                      + sum(w.size * w.dtype.itemsize for w in w_list)
                      + sum(b.size * b.dtype.itemsize for b in b_list)
                      + b_pad * out_pad * itemsize)

    # ---- explicit VMEM budget: resident params + 2x double-buffered tiles ----
    resident_bytes = (sum(w.size * w.dtype.itemsize for w in w_list)
                      + sum(b.size * b.dtype.itemsize for b in b_list))
    tile_bytes = (tb * in0 + tb * out_pad) * itemsize
    vmem_limit = min(max(resident_bytes + 4 * tile_bytes + (2 << 20), 16 << 20),
                     64 << 20)

    kernel = functools.partial(_mlp_fused_kernel, n_layers=n_layers)
    y_pad = pl.pallas_call(
        kernel,
        out_shape=jax.ShapeDtypeStruct((b_pad, out_pad), x.dtype),
        grid=grid,
        in_specs=in_specs,
        out_specs=out_specs,
        compiler_params=pltpu.CompilerParams(
            dimension_semantics=("parallel",),   # shards batch across v7x's 2 TCs
            vmem_limit_bytes=vmem_limit),
        cost_estimate=pl.CostEstimate(flops=flops,
                                      transcendentals=transcendentals,
                                      bytes_accessed=bytes_accessed),
    )(x_in, *w_list, *b_list)

    if trim_output:
        # Matches nn.Module semantics; costs one extra HBM pass over the output.
        return y_pad[:B, :out_dim]
    # Lane-padded (and batch-padded-trimmed) buffer for downstream fusion.
    return y_pad if b_pad == B else y_pad[:B]


def mlp_reference(params, x):
    """Plain-JAX reference for correctness check."""
    n_layers = len(params)
    h = x
    for i, (w_t, b) in enumerate(params):
        h = h @ w_t + b
        if i < n_layers - 1:
            h = jnp.tanh(h)
    return h


if __name__ == "__main__":
    sizes = (32, 64, 48, 16)   # MLP(sizes): 3 Linear layers, Tanh between them

    key = jax.random.PRNGKey(0)
    key, kx = jax.random.split(key)
    params = init_mlp_params(key, sizes)

    # --- small-batch f32 check (strict tolerance, module-exact semantics) ---
    batch = 8
    x = jax.random.normal(kx, (batch, sizes[0]), jnp.float32)
    prepped_f32 = prepare_params(params, compute_dtype=jnp.float32)
    out = jax.block_until_ready(mlp_forward(prepped_f32, x, out_dim=sizes[-1]))
    ref = jax.block_until_ready(mlp_reference(params, x))
    assert out.shape == (batch, sizes[-1]), out.shape
    assert jnp.allclose(out, ref, atol=1e-5, rtol=1e-5), "f32 mismatch vs reference"

    # --- larger-batch bf16-MXU check: exercises the batch grid (2 tiles of 256),
    #     resident weights, and the padded-output fast path ---
    key, kx2 = jax.random.split(key)
    batch2 = 512
    x2 = jax.random.normal(kx2, (batch2, sizes[0]), jnp.float32)
    prepped_bf16 = prepare_params(params, compute_dtype=jnp.bfloat16)
    out2 = jax.block_until_ready(
        mlp_forward(prepped_bf16, x2, out_dim=sizes[-1], tile_b=256,
                    trim_output=False))
    ref2 = jax.block_until_ready(mlp_reference(params, x2))
    assert out2.shape == (batch2, _round_up(sizes[-1], _LANES)), out2.shape
    assert jnp.allclose(out2[:, :sizes[-1]], ref2, atol=5e-2, rtol=5e-2), \
        "bf16 mismatch vs reference"

    print("KERNEL_OK")
</pallas_src>

<mosaic_0001>
module attributes {stable_mosaic.version = 11 : i64} {
  func.func @_mlp_fused_kernel(%arg0: i32, %arg1: memref<8x32xf32, #tpu.memory_space<vmem>>, %arg2: memref<32x128xf32, #tpu.memory_space<vmem>>, %arg3: memref<128x128xf32, #tpu.memory_space<vmem>>, %arg4: memref<128x128xf32, #tpu.memory_space<vmem>>, %arg5: memref<1x128xf32, #tpu.memory_space<vmem>>, %arg6: memref<1x128xf32, #tpu.memory_space<vmem>>, %arg7: memref<1x128xf32, #tpu.memory_space<vmem>>, %arg8: memref<8x128xf32, #tpu.memory_space<vmem>>) attributes {dimension_semantics = [#tpu.dimension_semantics<parallel>], iteration_bounds = array<i64: 1>, scalar_prefetch = 0 : i64, scratch_operands = 0 : i64, tpu.core_type = #tpu.core_type<tc>, window_params = [{transform_indices = @transform_0, window_bounds = array<i64: 8, 32>}, {pipeline_mode = #tpu.pipeline_mode<synchronous>, transform_indices = @transform_1, window_bounds = array<i64: 32, 128>}, {pipeline_mode = #tpu.pipeline_mode<synchronous>, transform_indices = @transform_2, window_bounds = array<i64: 128, 128>}, {pipeline_mode = #tpu.pipeline_mode<synchronous>, transform_indices = @transform_3, window_bounds = array<i64: 128, 128>}, {pipeline_mode = #tpu.pipeline_mode<synchronous>, transform_indices = @transform_4, window_bounds = array<i64: 1, 128>}, {pipeline_mode = #tpu.pipeline_mode<synchronous>, transform_indices = @transform_5, window_bounds = array<i64: 1, 128>}, {pipeline_mode = #tpu.pipeline_mode<synchronous>, transform_indices = @transform_6, window_bounds = array<i64: 1, 128>}, {transform_indices = @transform_7, window_bounds = array<i64: 8, 128>}]} {
    %c0 = arith.constant 0 : index
    %c0_0 = arith.constant 0 : index
    %0 = vector.load %arg1[%c0, %c0_0] : memref<8x32xf32, #tpu.memory_space<vmem>>, vector<8x32xf32>
    %c0_1 = arith.constant 0 : index
    %c0_2 = arith.constant 0 : index
    %1 = vector.load %arg2[%c0_1, %c0_2] : memref<32x128xf32, #tpu.memory_space<vmem>>, vector<32x128xf32>
    %cst = arith.constant dense<0.000000e+00> : vector<8x128xf32>
    %2 = tpu.matmul %0, %1, %cst {dimension_numbers = #tpu.dot_dimension_numbers<[1], [0], [0], [1], [0, 0, 1, 1], [], []>} : vector<8x32xf32>, vector<32x128xf32>, vector<8x128xf32> -> vector<8x128xf32>
    %c0_3 = arith.constant 0 : index
    %c0_4 = arith.constant 0 : index
    %3 = vector.load %arg5[%c0_3, %c0_4] : memref<1x128xf32, #tpu.memory_space<vmem>>, vector<1x128xf32>
    %4 = vector.broadcast %3 : vector<1x128xf32> to vector<8x128xf32>
    %5 = arith.addf %2, %4 : vector<8x128xf32>
    %6 = math.tanh %5 : vector<8x128xf32>
    %c0_5 = arith.constant 0 : index
    %c0_6 = arith.constant 0 : index
    %7 = vector.load %arg3[%c0_5, %c0_6] : memref<128x128xf32, #tpu.memory_space<vmem>>, vector<128x128xf32>
    %cst_7 = arith.constant dense<0.000000e+00> : vector<8x128xf32>
    %8 = tpu.matmul %6, %7, %cst_7 {dimension_numbers = #tpu.dot_dimension_numbers<[1], [0], [0], [1], [0, 0, 1, 1], [], []>} : vector<8x128xf32>, vector<128x128xf32>, vector<8x128xf32> -> vector<8x128xf32>
    %c0_8 = arith.constant 0 : index
    %c0_9 = arith.constant 0 : index
    %9 = vector.load %arg6[%c0_8, %c0_9] : memref<1x128xf32, #tpu.memory_space<vmem>>, vector<1x128xf32>
    %10 = vector.broadcast %9 : vector<1x128xf32> to vector<8x128xf32>
    %11 = arith.addf %8, %10 : vector<8x128xf32>
    %12 = math.tanh %11 : vector<8x128xf32>
    %c0_10 = arith.constant 0 : index
    %c0_11 = arith.constant 0 : index
    %13 = vector.load %arg4[%c0_10, %c0_11] : memref<128x128xf32, #tpu.memory_space<vmem>>, vector<128x128xf32>
    %cst_12 = arith.constant dense<0.000000e+00> : vector<8x128xf32>
    %14 = tpu.matmul %12, %13, %cst_12 {dimension_numbers = #tpu.dot_dimension_numbers<[1], [0], [0], [1], [0, 0, 1, 1], [], []>} : vector<8x128xf32>, vector<128x128xf32>, vector<8x128xf32> -> vector<8x128xf32>
    %c0_13 = arith.constant 0 : index
    %c0_14 = arith.constant 0 : index
    %15 = vector.load %arg7[%c0_13, %c0_14] : memref<1x128xf32, #tpu.memory_space<vmem>>, vector<1x128xf32>
    %16 = vector.broadcast %15 : vector<1x128xf32> to vector<8x128xf32>
    %17 = arith.addf %14, %16 : vector<8x128xf32>
    %c0_15 = arith.constant 0 : index
    %c0_16 = arith.constant 0 : index
    %18 = vector.load %arg8[%c0_15, %c0_16] : memref<8x128xf32, #tpu.memory_space<vmem>>, vector<8x128xf32>
    tpu.vector_store %arg8[%c0_15, %c0_16], %17 {strides = array<i32>} : memref<8x128xf32, #tpu.memory_space<vmem>>, vector<8x128xf32>,
    return
  }
  func.func @transform_0(%arg0: i32) -> (i32, i32) {
    %c0_i32 = arith.constant 0 : i32
    %c0_i32_0 = arith.constant 0 : i32
    return %arg0, %c0_i32 : i32, i32
  }
  func.func @transform_1(%arg0: i32) -> (i32, i32) {
    %c0_i32 = arith.constant 0 : i32
    %c0_i32_0 = arith.constant 0 : i32
    %c0_i32_1 = arith.constant 0 : i32
    return %c0_i32, %c0_i32_0 : i32, i32
  }
  func.func @transform_2(%arg0: i32) -> (i32, i32) {
    %c0_i32 = arith.constant 0 : i32
    %c0_i32_0 = arith.constant 0 : i32
    %c0_i32_1 = arith.constant 0 : i32
    return %c0_i32, %c0_i32_0 : i32, i32
  }
  func.func @transform_3(%arg0: i32) -> (i32, i32) {
    %c0_i32 = arith.constant 0 : i32
    %c0_i32_0 = arith.constant 0 : i32
    %c0_i32_1 = arith.constant 0 : i32
    return %c0_i32, %c0_i32_0 : i32, i32
  }
  func.func @transform_4(%arg0: i32) -> (i32, i32) {
    %c0_i32 = arith.constant 0 : i32
    %c0_i32_0 = arith.constant 0 : i32
    %c0_i32_1 = arith.constant 0 : i32
    return %c0_i32, %c0_i32_0 : i32, i32
  }
  func.func @transform_5(%arg0: i32) -> (i32, i32) {
    %c0_i32 = arith.constant 0 : i32
    %c0_i32_0 = arith.constant 0 : i32
    %c0_i32_1 = arith.constant 0 : i32
    return %c0_i32, %c0_i32_0 : i32, i32
  }
  func.func @transform_6(%arg0: i32) -> (i32, i32) {
    %c0_i32 = arith.constant 0 : i32
    %c0_i32_0 = arith.constant 0 : i32
    %c0_i32_1 = arith.constant 0 : i32
    return %c0_i32, %c0_i32_0 : i32, i32
  }
  func.func @transform_7(%arg0: i32) -> (i32, i32) {
    %c0_i32 = arith.constant 0 : i32
    %c0_i32_0 = arith.constant 0 : i32
    return %arg0, %c0_i32 : i32, i32
  }
}

</mosaic_0001>

<bundles_post_ra>
// kernel: mlp_forward.1
= control target key start
LH: loop header
LB: loop body
LE: loop exit
PB: predicated region body
PF: predicated region fallthrough
CT: control target
= control target key end

     0   :  { %12 = vsyncpa [#allocation3], 0  ;;  %s732_s0 = inlined_call_operand.vmem [shape: f32[8,32], index: 0, kind: input, shape index: {}]   ;;  %s733_s1 = inlined_call_operand.hbm [shape: f32[32,128], index: 1, kind: input, shape index: {}]   ;;  %s734_s2 = inlined_call_operand.hbm [shape: f32[128,128], index: 2, kind: input, shape index: {}]   ;;  %s735_s3 = inlined_call_operand.hbm [shape: f32[128,128], index: 3, kind: input, shape index: {}]   ;;  %s736_s4 = inlined_call_operand.vmem [shape: f32[1,128], index: 4, kind: input, shape index: {}]   ;;  %s737_s5 = inlined_call_operand.vmem [shape: f32[1,128], index: 5, kind: input, shape index: {}]   ;;  %s738_s6 = inlined_call_operand.hbm [shape: f32[1,128], index: 6, kind: input, shape index: {}]   ;;  %s739_s7 = inlined_call_operand.hbm [shape: f32[8,128], index: 7, kind: output, shape index: {}]  }
   0x1   :  { %13 = vsyncpa [#allocation6], 0 }
   0x2   :  { %14 = vsyncpa [#allocation9], 0 }
   0x3   :  { %15 = vsyncpa [#allocation4], 0  ;;  %s617_s24 = smov [#allocation5]   ;;  %s618_s26 = smov [#allocation2]  }
   0x4   :  { %s35_s25 = sshll.u32 %s617_s24, 4  ;;  %s23_s27 = sshll.u32 %s618_s26, 4  ;;  %s36_s25 = int_to_ptr.vmem [resolvable:$true] %s35_s25  ;;  %s24_s27 = int_to_ptr.vmem [resolvable:$true] %s23_s27 }
   0x5   :  { %s517_s28 = scalar_lea.vmem %s36_s25, 2048  ;;  %p522_p1 = scmp.lt.s32.totalorder %s36_s25, %s36_s25 }
   0x6   :  { %p518_p0 = scmp.ne.s32.totalorder %s36_s25, %s517_s28  ;;  %p523_p2 = scmp.lt.s32.totalorder %s517_s28, %s517_s28 }
   0x8   :  { %p524_p3 = por %p523_p2, %p522_p1 }
   0xa   :  { %p525_p4 = pnand %p524_p3, %p518_p0 }
   0xc   :  { %528 = shalt.err (!%p525_p4)
}
   0xd   :  { %s619_s29 = smov 128   ;;  %s620_s30 = smov 8  }
   0xe   :  { %41 = dma.hbm_to_vmem [thread:$0]  %s734_s2, 2048, %s36_s25, [#allocation6], %s619_s29, %s619_s29, %s620_s30  }
   0xf   :  { %s537_s10 = scalar_lea.vmem %s24_s27, 512  ;;  %p542_p6 = scmp.lt.s32.totalorder %s24_s27, %s24_s27 }
  0x10   :  { %p538_p5 = scmp.ne.s32.totalorder %s24_s27, %s537_s10  ;;  %p543_p7 = scmp.lt.s32.totalorder %s537_s10, %s537_s10 }
  0x12   :  { %p544_p8 = por %p543_p7, %p542_p6 }
  0x14   :  { %p545_p9 = pnand %p544_p8, %p538_p5 }
  0x16   :  { %548 = shalt.err (!%p545_p9)
}
  0x17   :  { %29 = dma.hbm_to_vmem [thread:$0]  %s733_s1, 512, %s24_s27, [#allocation3], %s619_s29, %s619_s29, %s620_s30  }
  0x18   :  { %s621_s13 = smov [#allocation7]   ;;  %s622_s15 = smov [#allocation8]  }
  0x19   :  { %s47_s14 = sshll.u32 %s621_s13, 4  ;;  %s64_s16 = sshll.u32 %s622_s15, 4  ;;  %s48_s14 = int_to_ptr.vmem [resolvable:$true] %s47_s14  ;;  %s65_s16 = int_to_ptr.vmem [resolvable:$true] %s64_s16 }
  0x1a   :  { %s557_s17 = scalar_lea.vmem %s48_s14, 2048  ;;  %p562_p11 = scmp.lt.s32.totalorder %s48_s14, %s48_s14 }
  0x1b   :  { %p558_p10 = scmp.ne.s32.totalorder %s48_s14, %s557_s17  ;;  %p563_p12 = scmp.lt.s32.totalorder %s557_s17, %s557_s17 }
  0x1d   :  { %p564_p13 = por %p563_p12, %p562_p11 }
  0x1f   :  { %p565_p0 = pnand %p564_p13, %p558_p10 }
  0x21   :  { %568 = shalt.err (!%p565_p0)
}
  0x22   :  { %53 = dma.hbm_to_vmem [thread:$0]  %s735_s3, 2048, %s48_s14, [#allocation6], %s619_s29, %s619_s29, %s620_s30  }
  0x23   :  { %s577_s19 = scalar_lea.vmem %s65_s16, 16  ;;  %s581_s1 = scalar_lea.vmem %s65_s16, 32 }
  0x24   :  { %p578_p1 = scmp.ne.s32.totalorder %s65_s16, %s577_s19  ;;  %p582_p2 = scmp.lt.s32.totalorder %s65_s16, %s65_s16 }
  0x25   :  { %p583_p3 = scmp.lt.s32.totalorder %s581_s1, %s577_s19 }
  0x27   :  { %p584_p4 = por %p583_p3, %p582_p2 }
  0x29   :  { %p585_p5 = pnand %p584_p4, %p578_p1 }
  0x2b   :  { %588 = shalt.err (!%p585_p5)
}
  0x2c   :  { %67 = dma.hbm_to_vmem [thread:$0]  %s738_s6, 16, %s65_s16, [#allocation9]  }
  0x2d   :  { %609 = dma.done.wait [#allocation3], 512  }
  0x2e   :  { %610 = vsyncadd [#allocation3], 4294966784 }
  0x2f   :  { %611 = dma.done.wait [#allocation6], 4096  }
  0x30   :  { %612 = vsyncadd [#allocation6], 4294963200 }
  0x31   :  { %613 = dma.done.wait [#allocation9], 16  }
  0x32   :  { %614 = vsyncadd [#allocation9], 4294967280  ;;  %v623_v0 = vmov 0.0   ;;  %vm624_vm0 = vmmov 0   ;;  %v84_v1 = vld [vmem:[#allocation2 + $0x18] sm:$0xff]  ;;  %v83_v2 = vld [vmem:[#allocation2 + $0x10] sm:$0xff] }
  0x33   :  { %415 = vmatprep.subr.mxu0 %v623_v0  ;;  %423 = vmatprep.mubr.msk.f32.mxu0 %vm624_vm0, %v623_v0  ;;  %v182_v3 = vld [vmem:[#allocation5 + $0x78] sm:$0xff]  ;;  %v82_v4 = vld [vmem:[#allocation2 + $0x8] sm:$0xff]  ;;  %v181_v5 = vld [vmem:[#allocation5 + $0x70] sm:$0xff]  ;;  %vm92_vm1 = vcmask 261120   ;;  %s625_s24 = smov [#allocation10]  }
  0x34   :  { %426 = vmatprep.subr.mxu1 %v623_v0  ;;  %458 = vmatprep.mubr.msk.f32.mxu1 %vm624_vm0, %v623_v0  ;;  %v180_v6 = vld [vmem:[#allocation5 + $0x68] sm:$0xff]  ;;  %v81_v7 = vld [vmem:[#allocation2] sm:$0xff]  ;;  %v178_v10 = vld [vmem:[#allocation5 + $0x58] sm:$0xff]  ;;  %s361_s25 = sshll.u32 %s625_s24, 4  ;;  %s362_s25 = int_to_ptr.vmem [resolvable:$true] %s361_s25 }
  0x35   :  { %416 = vmatpush3.msra.mxu0 %v84_v1  ;;  %427 = vmatpush3.msra.mxu1 %v182_v3  ;;  %v80_v8 = vld [vmem:[%s732_s0] sm:$0xff]  ;;  %v177_v11 = vld [vmem:[#allocation5 + $0x50] sm:$0xff]  ;;  %v176_v12 = vld [vmem:[#allocation5 + $0x48] sm:$0xff]  ;;  %s589_s26 = scalar_lea.vmem %s362_s25, 128  ;;  %p594_p7 = scmp.lt.s32.totalorder %s362_s25, %s362_s25 }
  0x36   :  { %417 = vmatprep.subr.mxu0 %v623_v0  ;;  %428 = vmatprep.subr.mxu1 %v623_v0  ;;  %v179_v9 = vld [vmem:[#allocation5 + $0x60] sm:$0xff]  ;;  %v174_v14 = vld [vmem:[#allocation5 + $0x38] sm:$0xff]  ;;  %v173_v15 = vld [vmem:[#allocation5 + $0x30] sm:$0xff]  ;;  %p590_p6 = scmp.ne.s32.totalorder %s362_s25, %s589_s26  ;;  %p595_p8 = scmp.lt.s32.totalorder %s589_s26, %s589_s26 }
  0x37   :  { %418 = vmatpush3.msra.mxu0 %v83_v2  ;;  %429 = vmatpush3.msra.mxu1 %v181_v5  ;;  %v175_v13 = vld [vmem:[#allocation5 + $0x40] sm:$0xff]  ;;  %v172_v16 = vld [vmem:[#allocation5 + $0x28] sm:$0xff]  ;;  %v170_v18 = vld [vmem:[#allocation5 + $0x18] sm:$0xff] }
  0x38   :  { %419 = vmatprep.subr.mxu0 %v623_v0  ;;  %430 = vmatprep.subr.mxu1 %v623_v0  ;;  %v171_v17 = vld [vmem:[#allocation5 + $0x20] sm:$0xff]  ;;  %v169_v19 = vld [vmem:[#allocation5 + $0x10] sm:$0xff]  ;;  %v168_v20 = vld [vmem:[#allocation5 + $0x8] sm:$0xff]  ;;  %p596_p9 = por %p595_p8, %p594_p7 }
  0x39   :  { %420 = vmatpush3.msra.mxu0 %v82_v4  ;;  %431 = vmatpush3.msra.mxu1 %v180_v6  ;;  %v167_v21 = vld [vmem:[#allocation5] sm:$0xff]  ;;  %v276_v22 = vld [vmem:[#allocation7 + $0x78] sm:$0xff]  ;;  %v275_v23 = vld [vmem:[#allocation7 + $0x70] sm:$0xff] }
  0x3a   :  { %421 = vmatprep.subr.mxu0 %v623_v0  ;;  %432 = vmatprep.subr.mxu1 %v623_v0  ;;  %v274_v24 = vld [vmem:[#allocation7 + $0x68] sm:$0xff]  ;;  %v273_v25 = vld [vmem:[#allocation7 + $0x60] sm:$0xff]  ;;  %v272_v26 = vld [vmem:[#allocation7 + $0x58] sm:$0xff]  ;;  %p597_p10 = pnand %p596_p9, %p590_p6 }
  0x3b   :  { %422 = vmatpush3.msra.mxu0 %v81_v7  ;;  %433 = vmatpush3.msra.mxu1 %v179_v9  ;;  %v271_v27 = vld [vmem:[#allocation7 + $0x50] sm:$0xff]  ;;  %v270_v28 = vld [vmem:[#allocation7 + $0x48] sm:$0xff]  ;;  %v372_v29 = vld [vmem:[%s736_s4] ss:$0 sm:$0xff] }
  0x3c   :  { %424 = vmatmul.mubr.msk.f32.vlgmr.msra.gmra.mxu0 %vm92_vm1, %v80_v8  ;;  %434 = vmatprep.subr.mxu1 %v623_v0  ;;  %v269_v34 = vld [vmem:[#allocation7 + $0x40] sm:$0xff]  ;;  %v268_v35 = vld [vmem:[#allocation7 + $0x38] sm:$0xff]  ;;  %v267_v36 = vld [vmem:[#allocation7 + $0x30] sm:$0xff] }
  0x3d   :  { %461 = vmatprep.subr.mxu0 %v623_v0  ;;  %435 = vmatpush3.msra.mxu1 %v178_v10  ;;  %v266_v37 = vld [vmem:[#allocation7 + $0x28] sm:$0xff]  ;;  %v265_v38 = vld [vmem:[#allocation7 + $0x20] sm:$0xff]  ;;  %v264_v39 = vld [vmem:[#allocation7 + $0x18] sm:$0xff] }
  0x3e   :  { %493 = vmatprep.mubr.msk.f32.mxu0 %vm624_vm0, %v623_v0  ;;  %436 = vmatprep.subr.mxu1 %v623_v0  ;;  %v263_v40 = vld [vmem:[#allocation7 + $0x10] sm:$0xff]  ;;  %v262_v41 = vld [vmem:[#allocation7 + $0x8] sm:$0xff]  ;;  %v261_v42 = vld [vmem:[#allocation7] sm:$0xff] }
  0x3f   :  { %437 = vmatpush3.msra.mxu1 %v177_v11  ;;  %462 = vmatpush3.msra.mxu0 %v276_v22  ;;  %v374_v43 = vld [vmem:[%s737_s5] ss:$0 sm:$0xff] }
  0x40   :  { %438 = vmatprep.subr.mxu1 %v623_v0  ;;  %463 = vmatprep.subr.mxu0 %v623_v0  ;;  %v375_v48 = vld [vmem:[#allocation8] ss:$0 sm:$0xff] }
  0x41   :  { %439 = vmatpush3.msra.mxu1 %v176_v12  ;;  %464 = vmatpush3.msra.mxu0 %v275_v23 }
  0x42   :  { %440 = vmatprep.subr.mxu1 %v623_v0  ;;  %465 = vmatprep.subr.mxu0 %v623_v0 }
  0x43   :  { %441 = vmatpush3.msra.mxu1 %v175_v13  ;;  %466 = vmatpush3.msra.mxu0 %v274_v24 }
  0x44   :  { %442 = vmatprep.subr.mxu1 %v623_v0  ;;  %467 = vmatprep.subr.mxu0 %v623_v0 }
  0x45   :  { %443 = vmatpush3.msra.mxu1 %v174_v14  ;;  %468 = vmatpush3.msra.mxu0 %v273_v25 }
  0x46   :  { %444 = vmatprep.subr.mxu1 %v623_v0  ;;  %469 = vmatprep.subr.mxu0 %v623_v0 }
  0x47   :  { %445 = vmatpush3.msra.mxu1 %v173_v15  ;;  %470 = vmatpush3.msra.mxu0 %v272_v26 }
  0x48   :  { %446 = vmatprep.subr.mxu1 %v623_v0  ;;  %471 = vmatprep.subr.mxu0 %v623_v0 }
  0x49   :  { %447 = vmatpush3.msra.mxu1 %v172_v16  ;;  %472 = vmatpush3.msra.mxu0 %v271_v27 }
  0x4a   :  { %448 = vmatprep.subr.mxu1 %v623_v0  ;;  %473 = vmatprep.subr.mxu0 %v623_v0 }
  0x4b   :  { %449 = vmatpush3.msra.mxu1 %v171_v17  ;;  %474 = vmatpush3.msra.mxu0 %v270_v28 }
  0x4c   :  { %450 = vmatprep.subr.mxu1 %v623_v0  ;;  %475 = vmatprep.subr.mxu0 %v623_v0 }
  0x4d   :  { %451 = vmatpush3.msra.mxu1 %v170_v18  ;;  %476 = vmatpush3.msra.mxu0 %v269_v34 }
  0x4e   :  { %452 = vmatprep.subr.mxu1 %v623_v0  ;;  %477 = vmatprep.subr.mxu0 %v623_v0 }
  0x4f   :  { %453 = vmatpush3.msra.mxu1 %v169_v19  ;;  %478 = vmatpush3.msra.mxu0 %v268_v35 }
  0x50   :  { %454 = vmatprep.subr.mxu1 %v623_v0  ;;  %479 = vmatprep.subr.mxu0 %v623_v0 }
  0x51   :  { %455 = vmatpush3.msra.mxu1 %v168_v20  ;;  %480 = vmatpush3.msra.mxu0 %v267_v36 }
  0x52   :  { %456 = vmatprep.subr.mxu1 %v623_v0  ;;  %481 = vmatprep.subr.mxu0 %v623_v0 }
  0x53   :  { %457 = vmatpush3.msra.mxu1 %v167_v21  ;;  %482 = vmatpush3.msra.mxu0 %v266_v37 }
  0x54   :  { %483 = vmatprep.subr.mxu0 %v623_v0 }
  0x55   :  { %484 = vmatpush3.msra.mxu0 %v265_v38 }
  0x56   :  { %485 = vmatprep.subr.mxu0 %v623_v0 }
  0x57   :  { %486 = vmatpush3.msra.mxu0 %v264_v39 }
  0x58   :  { %487 = vmatprep.subr.mxu0 %v623_v0 }
  0x59   :  { %488 = vmatpush3.msra.mxu0 %v263_v40 }
  0x5a   :  { %489 = vmatprep.subr.mxu0 %v623_v0 }
  0x5b   :  { %490 = vmatpush3.msra.mxu0 %v262_v41 }
  0x5c   :  { %491 = vmatprep.subr.mxu0 %v623_v0 }
  0x5d   :  { %492 = vmatpush3.msra.mxu0 %v261_v42 }
  0xfc   :  { %v162_v30 = vpop.f32.mrf.mxu0 }
  0xfd   :  { %v163_v31 = vadd.f32 %v372_v29, %v162_v30 }
  0xfe   :  { %v425_v32 = vpop.f32.mrf.mxu0 }
  0xff   :  { %505 = vtanh.f32 %v163_v31 }
 0x10c   :  { %v506_v33 = vpop.eup %505 }
 0x10d   :  { %459 = vmatmul.mubr.f32.vlgmr.msra.gmra.mxu1 %v506_v33 }
 0x1cd   :  { %v256_v44 = vpop.f32.mrf.mxu1 }
 0x1ce   :  { %v257_v45 = vadd.f32 %v374_v43, %v256_v44 }
 0x1cf   :  { %v460_v46 = vpop.f32.mrf.mxu1 }
 0x1d0   :  { %507 = vtanh.f32 %v257_v45 }
 0x1dd   :  { %v508_v47 = vpop.eup %507 }
 0x1de   :  { %494 = vmatmul.mubr.f32.vlgmr.msra.gmra.mxu0 %v508_v47 }
 0x29e   :  { %v350_v49 = vpop.f32.mrf.mxu0 }
 0x29f   :  { %v351_v50 = vadd.f32 %v375_v48, %v350_v49 }
 0x2a0   :  { %v495_v51 = vpop.f32.mrf.mxu0 }
 0x2a1   :  { %354 = vst [vmem:[#allocation10] sm:$0xff] %v351_v50 }
 0x2a2   :  { %600 = shalt.err (!%p597_p10)
}
 0x2a3   :  { %364 = dma.vmem_to_hbm [thread:$0]  %s362_s25, 128, %s739_s7, [#allocation4]  }
 0x2a4   :  { %615 = dma.done.wait [#allocation4], 128  }
 0x2a5   :  { %616 = vsyncadd [#allocation4], 4294967168 }
 0x2a6   :  { %368 = vsyncpa [#allocation3], 1 }
 0x2a7   :  { %369 = vsyncpa [#allocation6], 1 }
 0x2a8   :  { %370 = vsyncpa [#allocation9], 1 }
 0x2a9   :  { %371 = vsyncpa [#allocation4], 1 }

</bundles_post_ra>
